<compile_context>
chip_gen: v5e
topology: v5e:2x2
jax: 0.10.0
libtpu: 0.0.40
codegen_flags: <defaults>
</compile_context>

<pallas_src>
import jax
import jax.numpy as jnp
from jax.experimental import pallas as pl
from jax.experimental.pallas import tpu as pltpu


_VMEM_LIMIT_BYTES = 48 * 1024 * 1024  # headroom under v7x's 64 MiB VMEM


def _pick_tile(dim, preferred, align):
    """Largest tile <= preferred that is `align`-aligned and divides `dim`.

    Falls back to the full dimension (always a legal block size)."""
    if dim <= preferred:
        return dim
    t = (preferred // align) * align
    while t >= align:
        if dim % t == 0:
            return t
        t -= align
    return dim


# ----------------------------- Pallas kernels --------------------------------

def _xw_kernel(x_ref, w_ref, xw_ref):
    # (N, in_dim) @ (in_dim, out_pad) on the MXU; result rounded to bf16 so the
    # big phase-2 matmul streams bf16 operands.
    xw_ref[...] = jnp.dot(
        x_ref[...], w_ref[...], preferred_element_type=jnp.float32
    ).astype(xw_ref.dtype)


def _spmm_kernel(spow_ref, xw_ref, o_ref):
    # grid = (M tiles, K, N tiles); (k, n) is the joint reduction.
    k = pl.program_id(1)
    n = pl.program_id(2)

    @pl.when(jnp.logical_and(k == 0, n == 0))
    def _():
        o_ref[...] = jnp.zeros_like(o_ref)

    # (tm, tn) @ (tn, out_pad) on the MXU, accumulated directly into the
    # resident f32 output tile (no scratch accumulator needed).
    o_ref[...] += jnp.dot(
        spow_ref[...], xw_ref[...], preferred_element_type=jnp.float32
    )


# ------------------------------- wrapper --------------------------------------

def gcnh_forward(spow, x, w, *, compute_dtype=jnp.bfloat16):
    """spow: (K, N, N), x: (N, in_dim), w: (K, in_dim, out_dim) -> (N, out_dim)."""
    K, N, _ = spow.shape
    in_dim = x.shape[1]
    out_dim = w.shape[2]

    # Lane-dense output: pad out_dim up to a multiple of 128, slice afterwards.
    out_pad = ((out_dim + 127) // 128) * 128
    if out_pad != out_dim:
        w = jnp.pad(w, ((0, 0), (0, 0), (0, out_pad - out_dim)))

    spow_c = spow.astype(compute_dtype)
    x_c = x.astype(compute_dtype)
    w_c = w.astype(compute_dtype)

    # ---------------- phase 1: XW[k] = x @ W_pad[k] ----------------
    xw = pl.pallas_call(
        _xw_kernel,
        out_shape=jax.ShapeDtypeStruct((K, N, out_pad), compute_dtype),
        grid_spec=pl.GridSpec(
            grid=(K,),
            in_specs=[
                # x is constant across k: block index never changes, so it
                # stays resident in VMEM.
                pl.BlockSpec((N, in_dim), lambda k: (0, 0)),
                pl.BlockSpec((pl.Squeezed(), in_dim, out_pad),
                             lambda k: (k, 0, 0)),
            ],
            out_specs=pl.BlockSpec((pl.Squeezed(), N, out_pad),
                                   lambda k: (k, 0, 0)),
        ),
        compiler_params=pltpu.CompilerParams(
            dimension_semantics=("parallel",),
            vmem_limit_bytes=_VMEM_LIMIT_BYTES,
        ),
    )(x_c, w_c)

    # ---------------- phase 2: out = sum_{k,n} Spow[k] @ XW[k] ----------------
    tm = _pick_tile(N, 256, 8)    # output / Spow row tile (sublane axis)
    tn = _pick_tile(N, 512, 128)  # contraction tile (Spow lane / XW sublane)

    out_full = pl.pallas_call(
        _spmm_kernel,
        out_shape=jax.ShapeDtypeStruct((N, out_pad), jnp.float32),
        grid_spec=pl.GridSpec(
            grid=(N // tm, K, N // tn),
            in_specs=[
                pl.BlockSpec((pl.Squeezed(), tm, tn),
                             lambda m, k, n: (k, m, n)),
                pl.BlockSpec((pl.Squeezed(), tn, out_pad),
                             lambda m, k, n: (k, n, 0)),
            ],
            out_specs=pl.BlockSpec((tm, out_pad), lambda m, k, n: (m, 0)),
        ),
        compiler_params=pltpu.CompilerParams(
            dimension_semantics=("parallel", "arbitrary", "arbitrary"),
            vmem_limit_bytes=_VMEM_LIMIT_BYTES,
        ),
    )(spow_c, xw)

    return out_full[:, :out_dim]


# ---------------------- parameter construction (glue) -----------------------

def build_gcnh_params(key, S_raw, in_dim, out_dim, K):
    """Reproduce GCNHLayer.__init__ precomputation in plain JAX."""
    N = S_raw.shape[0]
    # S += I ; symmetric degree normalization D^{-1/2} S D^{-1/2}
    S = S_raw + jnp.eye(N, dtype=jnp.float32)
    d = S.sum(axis=1)
    D_inv = jnp.diag(1.0 / jnp.sqrt(d))
    S = D_inv @ S @ D_inv

    # Spow[0] = I, Spow[k] = Spow[k-1] @ S
    spow = [jnp.eye(N, dtype=jnp.float32)]
    for _ in range(1, K):
        spow.append(spow[-1] @ S)
    Spow = jnp.stack(spow, axis=0)  # (K, N, N)

    # nn.init.kaiming_uniform_ with defaults (a=0) on a (K, in_dim, out_dim)
    # tensor: fan_in = in_dim * out_dim, bound = sqrt(6 / fan_in).
    fan_in = in_dim * out_dim
    bound = jnp.sqrt(6.0 / fan_in)
    W = jax.random.uniform(
        key, (K, in_dim, out_dim), dtype=jnp.float32, minval=-bound, maxval=bound
    )
    return Spow, W


# --------------------------------- main --------------------------------------

if __name__ == "__main__":
    key = jax.random.PRNGKey(0)
    k_s, k_w, k_x = jax.random.split(key, 3)

    # Small, module-consistent shapes: N nodes, in_dim -> out_dim, K hops.
    N, in_dim, out_dim, K = 16, 8, 32, 3

    # Deterministic symmetric adjacency (no self-loops; module adds eye itself)
    A = (jax.random.uniform(k_s, (N, N)) > 0.7).astype(jnp.float32)
    S_raw = jnp.maximum(A, A.T) * (1.0 - jnp.eye(N, dtype=jnp.float32))

    Spow, W = build_gcnh_params(k_w, S_raw, in_dim, out_dim, K)
    x = jax.random.normal(k_x, (N, in_dim), dtype=jnp.float32)

    out = gcnh_forward(Spow, x, W)
    out = jax.block_until_ready(out)

    # Reference check in plain JAX f32 (same math as the PyTorch forward loop).
    ref = jnp.zeros((N, out_dim), dtype=jnp.float32)
    for k in range(K):
        ref = ref + Spow[k] @ x @ W[k]

    assert out.shape == (N, out_dim)
    # bf16 MXU operands + f32 accumulation -> loose-ish tolerance vs f32 ref.
    assert jnp.allclose(out, ref, atol=5e-2, rtol=5e-2), (
        jnp.max(jnp.abs(out - ref))
    )

    print("KERNEL_OK")
</pallas_src>

<mosaic_0001>
module attributes {stable_mosaic.version = 11 : i64} {
  func.func @_xw_kernel(%arg0: i32, %arg1: memref<16x8xbf16, #tpu.memory_space<vmem>>, %arg2: memref<1x8x128xbf16, #tpu.memory_space<vmem>>, %arg3: memref<1x16x128xbf16, #tpu.memory_space<vmem>>) attributes {dimension_semantics = [#tpu.dimension_semantics<parallel>], iteration_bounds = array<i64: 3>, scalar_prefetch = 0 : i64, scratch_operands = 0 : i64, tpu.core_type = #tpu.core_type<tc>, window_params = [{pipeline_mode = #tpu.pipeline_mode<synchronous>, transform_indices = @transform_0, window_bounds = array<i64: 16, 8>}, {transform_indices = @transform_1, window_bounds = array<i64: 1, 8, 128>}, {transform_indices = @transform_2, window_bounds = array<i64: 1, 16, 128>}]} {
    %c0 = arith.constant 0 : index
    %c0_0 = arith.constant 0 : index
    %0 = vector.load %arg1[%c0, %c0_0] : memref<16x8xbf16, #tpu.memory_space<vmem>>, vector<16x8xbf16>
    %c0_1 = arith.constant 0 : index
    %c0_2 = arith.constant 0 : index
    %c0_3 = arith.constant 0 : index
    %1 = vector.load %arg2[%c0_1, %c0_2, %c0_3] : memref<1x8x128xbf16, #tpu.memory_space<vmem>>, vector<1x8x128xbf16>
    %2 = vector.shape_cast %1 : vector<1x8x128xbf16> to vector<8x128xbf16>
    %cst = arith.constant dense<0.000000e+00> : vector<16x128xf32>
    %3 = tpu.matmul %0, %2, %cst {dimension_numbers = #tpu.dot_dimension_numbers<[1], [0], [0], [1], [0, 0, 1, 1], [], []>} : vector<16x8xbf16>, vector<8x128xbf16>, vector<16x128xf32> -> vector<16x128xf32>
    %4 = arith.truncf %3 : vector<16x128xf32> to vector<16x128xbf16>
    %c0_4 = arith.constant 0 : index
    %c0_5 = arith.constant 0 : index
    %c0_6 = arith.constant 0 : index
    %5 = vector.load %arg3[%c0_4, %c0_5, %c0_6] : memref<1x16x128xbf16, #tpu.memory_space<vmem>>, vector<1x16x128xbf16>
    %6 = vector.shape_cast %5 : vector<1x16x128xbf16> to vector<16x128xbf16>
    %7 = vector.shape_cast %4 : vector<16x128xbf16> to vector<1x16x128xbf16>
    tpu.vector_store %arg3[%c0_4, %c0_5, %c0_6], %7 {strides = array<i32>} : memref<1x16x128xbf16, #tpu.memory_space<vmem>>, vector<1x16x128xbf16>,
    return
  }
  func.func @transform_0(%arg0: i32) -> (i32, i32) {
    %c0_i32 = arith.constant 0 : i32
    %c0_i32_0 = arith.constant 0 : i32
    %c0_i32_1 = arith.constant 0 : i32
    return %c0_i32, %c0_i32_0 : i32, i32
  }
  func.func @transform_1(%arg0: i32) -> (i32, i32, i32) {
    %c0_i32 = arith.constant 0 : i32
    %c0_i32_0 = arith.constant 0 : i32
    %c0_i32_1 = arith.constant 0 : i32
    return %arg0, %c0_i32, %c0_i32_0 : i32, i32, i32
  }
  func.func @transform_2(%arg0: i32) -> (i32, i32, i32) {
    %c0_i32 = arith.constant 0 : i32
    %c0_i32_0 = arith.constant 0 : i32
    %c0_i32_1 = arith.constant 0 : i32
    return %arg0, %c0_i32, %c0_i32_0 : i32, i32, i32
  }
}

</mosaic_0001>

<bundles_post_ra>
// kernel: tpu_custom_call.1
= control target key start
LH: loop header
LB: loop body
LE: loop exit
PB: predicated region body
PF: predicated region fallthrough
CT: control target
= control target key end

     0   :  { %7 = vsyncpa [#allocation3], 0  ;;  %s485_s0 = inlined_call_operand.vmem [shape: bf16[16,8], index: 0, kind: input, shape index: {}]   ;;  %s486_s1 = inlined_call_operand.vmem [shape: bf16[3,8,128], index: 1, kind: input, shape index: {}]   ;;  %s487_s2 = inlined_call_operand.hbm [shape: bf16[3,16,128], index: 2, kind: output, shape index: {}]  }
   0x1   :  { %9 = vsyncpa [#allocation3 + $0x1], 0  ;;  %s397_s9 = smov 0   ;;  %s399_s10 = smov 0  }
   0x2   :  { %s401_s11 = smov 0   ;;  %s403_s12 = smov 0  }
   0x3 LB: > { %s418_s13 = sadd.s32 4294967295, %s378_s12   ;;  %s252_s14 = sadd.s32 4294967294, %s378_s12   ;;  %s378_s12 = sphi %s403_s12, %s493_s12   ;;  %s374_s11 = sphi %s401_s11, %s492_s11   ;;  %s370_s10 = sphi %s399_s10, %s491_s10   ;;  %s366_s9 = sphi %s397_s9, %s490_s9  }
   0x4   : > { %s422_s15 = sadd.s32 1, %s378_s12   ;;  %s69_s16 = sadd.s32 1, %s374_s11 }
   0x5   : > { %s66_s17 = ssub.s32 %s378_s12, %s422_s15  ;;  %p79_p0 = scmp.ne.s32.totalorder %s374_s11, %s370_s10 }
   0x6   : > { %p67_p1 = scmp.eq.s32.totalorder %s66_s17, 0  ;;  %p80_p2 = scmp.eq.s32.totalorder %s418_s13, 2 }
   0x7   : > { %p85_p3 = scmp.ne.s32.totalorder %s370_s10, %s366_s9  ;;  %p86_p4 = scmp.eq.s32.totalorder %s252_s14, 2 }
   0x8   : > { %s433_s18 = scalar_select %p67_p1, %s374_s11, %s69_s16  }
   0x9   : > { %p435_p5 = por %p80_p2, %p79_p0  ;;  %p439_p6 = por %p86_p4, %p85_p3 }
   0xa   : > { %p255_p7 = scmp.ge.s32.totalorder %s378_s12, 1  ;;  %p114_p8 = scmp.lt.s32.totalorder %s378_s12, 4 }
   0xc   : > { %p115_p9 = pnand %p255_p7, %p114_p8 }
   0xd   : > { %p135_p10 = scmp.lt.s32.totalorder (!%p115_p9), %s418_s13, 2  ;;  %s132_s28 = sand.u32 (!%p115_p9), 1, %s370_s10  }
   0xe   : > { %118 = sbr.rel (%p115_p9) target bundleno = 168 (0xa8), region = 28  ;;  %s256_s29 = sshll.u32 (!%p115_p9), %s132_s28, 3 }
   0xf   : > { %s269_s30 = sshll.u32 (!%p115_p9), %s418_s13, 3  ;;  %s134_s6 = scalar_lea.vmem (!%p115_p9), [#allocation2], %s256_s29 }
  0x10   : > { %s186_s5 = scalar_lea.hbm (!%p115_p9), %s487_s2, %s269_s30  ;;  %s187_s7 = sshll.u32 (!%p115_p9), %s134_s6, 4  ;;  %s188_s7 = int_to_ptr.vmem [resolvable:$true] %s187_s7 }
  0x11   : > { %s189_s8 = sshll.u32 (!%p115_p9), %s186_s5, 4  ;;  %s175_s14 = scalar_lea.sflag (!%p115_p9), [#allocation3], %s132_s28  ;;  %s190_s8 = int_to_ptr.hbm [resolvable:$true] %s189_s8 }
  0x12   : > { %s330_s16 = sshra.s32 (!%p115_p9), %s190_s8, 4  ;;  %s331_s16 = int_to_ptr.hbm [resolvable:$true] %s330_s16 }
  0x13   : > { %s136_s21 = scalar_select %p135_p10, %s418_s13, 2  ;;  %vm152_vm0 = vcmask 1043456   ;;  %v268_v2 = vld [vmem:[%s485_s0] sm:$0xff]  ;;  %vm148_vm1 = vcmask 64512  }
  0x14   : > { %s332_s17 = scalar_lea.hbm %s331_s16, 8  ;;  %p337_p0 = scmp.lt.s32.totalorder %s331_s16, %s487_s2 }
  0x15   : > { %s257_s22 = sshll.u32 %s136_s21, 2  ;;  %p333_p11 = scmp.ne.s32.totalorder %s331_s16, %s332_s17 }
  0x16   : > { %s138_s25 = scalar_lea.vmem %s486_s1, %s257_s22  ;;  %s336_s22 = scalar_lea.hbm %s487_s2, 24 }
  0x17   : > { %v142_v0 = vld [vmem:[%s138_s25] sm:$0xf]  ;;  %p334_p12 = pnand %p333_p11, %p435_p5  ;;  %p338_p1 = scmp.lt.s32.totalorder %s336_s22, %s332_s17 }
  0x18   : > { %v154_v1 = vsel %vm152_vm0, %v142_v0, 0 }
  0x19   : > { %163 = vmatpush.bf16.msra.mxu0 %v154_v1  ;;  %p335_p13 = pneg %p334_p12  ;;  %p339_p2 = por %p338_p1, %p337_p0 }
  0x1b   : > { %p340_p3 = pnand %p339_p2, %p335_p13 }
  0x1c   : > { %262 = vmatmul.msk.bf16.vlgmr.msra.gmra.mxu0 %vm148_vm1, %v268_v2 }
  0x99   : > { %v165_v3 = vpop.f32.mrf.mxu0 }
  0xa1   : > { %v167_v4 = vpop.f32.mrf.mxu0 }
  0xa2   : > { %v273_v5 = vpack.c.bf16 %v167_v4, %v165_v3 }
  0xa4   : > { %274 = vst [vmem:[%s134_s6] sm:$0xff] %v273_v5  }
  0xa5   : > { %343 = shalt.err (!%p340_p3)
}
  0xa6   : > { %s380_s25 = smov 64   ;;  %s381_s26 = smov 4  }
  0xa7   : > { %275 = dma.vmem_to_hbm [thread:$0]  (%p435_p5), %s188_s7, 128, %s190_s8, %s175_s14, %s380_s25, %s380_s25, %s381_s26  }
  0xa8 PF: > { %p281_p4 = scmp.ge.s32.totalorder %s378_s12, 2  ;;  %s204_s27 = sand.u32 1, %s366_s9  }
  0xa9   : > { %s205_s28 = scalar_lea.sflag [#allocation3], %s204_s27 }
  0xaa   : > { %p278_p7 = pnand %p281_p4, %p439_p6 }
  0xac   : > { %p279_p8 = pneg %p278_p7 }
  0xae   : > { %361 = dma.done.wait (%p279_p8), %s205_s28, 128  }
  0xaf   : > { %363 = vsyncadd (%p279_p8), %s205_s28, 4294967168  ;;  %p12_p9 = scmp.ge.s32.totalorder %s422_s15, 5   ;;  %s490_s9 = smov %s370_s10 }
  0xb0   : > { %s491_s10 = smov %s374_s11  ;;  %s492_s11 = smov %s433_s18 }
  0xb1   : > { %s493_s12 = smov %s422_s15  ;;  %14 = sbr.rel (!%p12_p9) target bundleno = 3 (0x3), region = 63 }
  0xb6   :  { %211 = vsyncpa [#allocation3], 1 }
  0xb7   :  { %213 = vsyncpa [#allocation3 + $0x1], 1 }

</bundles_post_ra>
